<compile_context>
chip_gen: v6e
topology: v6e:2x2x1
jax: 0.10.0
libtpu: 0.0.40
codegen_flags: <defaults>
</compile_context>

<pallas_src>
import math

import jax
import jax.numpy as jnp
from jax import lax
from jax.experimental import pallas as pl
from jax.experimental.pallas import tpu as pltpu

INV_SQRT2 = 1.0 / math.sqrt(2.0)
_TS_MAX = 512          # S rows per grid step once tiling kicks in


def _round_up(x, m):
    return ((x + m - 1) // m) * m


def _choose_tile(s_len):
    # s_len <= 128: one full-extent block (block dims == array dims, so the
    # (8,128) divisibility rule does not apply).  Otherwise: a multiple of
    # 128 (lane-aligned (1, ts) output blocks, sublane-aligned inputs) chosen
    # so the grid has at least two steps -> both v7x TensorCores get work.
    if s_len <= 128:
        return s_len
    return min(_TS_MAX, _round_up(-(-s_len // 2), 128))


# ---------------------------------------------------------------------------
# Fused kernel
#   branch 1: relu(x @ mw1 + mb1) for wt/mt halves -> diff -> folded
#             (mlp2 ∘ out1) row contraction                  => hid_diff (1,ts)
#   branch 2: fused masked-logit reduce -> Linear(1,64) GELU -> folded
#             (lt2 ∘ out2) row contraction                   => lg       (1,ts)
#   out = hid_diff + lg ; logits = lg
# ---------------------------------------------------------------------------
def _fused_kernel(hid_wt_ref, hid_mt_ref,
                  wt_lg_ref, mt_lg_ref, wt_id_ref, mt_id_ref,
                  mw1_ref, mb1_ref, w_head_ref,
                  lw1_ref, lb1_ref, w_lt_ref,
                  b_lt_ref,
                  out_ref, logits_ref):
    b_lt = b_lt_ref[0, 0]                       # folded out2 bias (SMEM scalar)

    # ---- branch 1: Linear(384,256)+ReLU on both halves (bf16 MXU, f32 acc) --
    def hidden(x_ref):                                          # (ts, 384) bf16
        h = jnp.dot(x_ref[...], mw1_ref[...],
                    preferred_element_type=jnp.float32)
        return jnp.maximum(h + mb1_ref[...], 0.0)               # (ts, 256) f32

    d = (hidden(hid_mt_ref) - hidden(hid_wt_ref)).astype(jnp.bfloat16)
    # folded (mlp2 ∘ out1) row weight contracted against the feature axis:
    # (1,256) . (ts,256)^T -> lane-dense (1, ts); folded biases cancel in the
    # mt - wt difference.
    hid_diff = lax.dot_general(w_head_ref[...], d, (((1,), (1,)), ((), ())),
                               preferred_element_type=jnp.float32)   # (1, ts)

    # ---- branch 2: fused masked-logit reduction + logits_trans + folded out2
    s = jnp.sum(wt_lg_ref[...] * wt_id_ref[...]
                - mt_lg_ref[...] * mt_id_ref[...],
                axis=1, keepdims=True)                          # (ts, 1) f32
    g = s * lw1_ref[...] + lb1_ref[...]                         # (ts, 64)
    g = 0.5 * g * (1.0 + lax.erf(g * INV_SQRT2))                # exact GELU
    lg = lax.dot_general(w_lt_ref[...], g, (((1,), (1,)), ((), ())),
                         preferred_element_type=jnp.float32) + b_lt  # (1, ts)

    logits_ref[...] = lg
    out_ref[...] = hid_diff + lg


def fused_ppi_head_pallas(hid_wt_x, hid_mt_x, wt_logits, mt_logits,
                          wt_id, mt_id,
                          mw1_bf16, mb1, w_head_row,
                          lw1, lb1, w_lt_row, b_lt):
    s_len = hid_wt_x.shape[0]
    v = wt_logits.shape[1]

    ts = _choose_tile(s_len)
    grid = (-(-s_len // ts),)                   # partial trailing block is OK:
                                                # all math is row-wise and OOB
                                                # output lanes are masked.

    hid_spec = pl.BlockSpec((ts, 384), lambda i: (i, 0))
    lg_spec = pl.BlockSpec((ts, v), lambda i: (i, 0))
    w_spec = lambda r, c: pl.BlockSpec((r, c), lambda i: (0, 0))  # resident
    smem_scalar = pl.BlockSpec((1, 1), lambda i: (0, 0),
                               memory_space=pltpu.MemorySpace.SMEM)
    out_spec = pl.BlockSpec((1, ts), lambda i: (0, i))            # lane-dense

    out2d, logits2d = pl.pallas_call(
        _fused_kernel,
        out_shape=(jax.ShapeDtypeStruct((1, s_len), jnp.float32),
                   jax.ShapeDtypeStruct((1, s_len), jnp.float32)),
        grid_spec=pltpu.PrefetchScalarGridSpec(
            num_scalar_prefetch=0,
            grid=grid,
            in_specs=[hid_spec, hid_spec,
                      lg_spec, lg_spec, lg_spec, lg_spec,
                      w_spec(384, 256), w_spec(1, 256), w_spec(1, 256),
                      w_spec(1, 64), w_spec(1, 64), w_spec(1, 64),
                      smem_scalar],
            out_specs=(out_spec, out_spec)),
        compiler_params=pltpu.CompilerParams(
            dimension_semantics=("parallel",)),
    )(hid_wt_x, hid_mt_x, wt_logits, mt_logits, wt_id, mt_id,
      mw1_bf16, mb1, w_head_row,
      lw1, lb1, w_lt_row, b_lt)

    return out2d[0], logits2d[0]


# ---------------------------------------------------------------------------
# Parameters (deterministic, PyTorch-Linear-like init) + synthetic encoder
# ---------------------------------------------------------------------------
def _linear_params(key, fan_in, fan_out):
    kw, kb = jax.random.split(key)
    bound = 1.0 / math.sqrt(fan_in)
    w = jax.random.uniform(kw, (fan_in, fan_out), jnp.float32, -bound, bound)
    b = jax.random.uniform(kb, (1, fan_out), jnp.float32, -bound, bound)
    return w, b


def init_params(key, d_node, d_edge, vocab):
    keys = jax.random.split(key, 10)
    enc_layers = [
        _linear_params(keys[0], d_node + d_edge, 128),
        _linear_params(keys[1], 128, 128),
        _linear_params(keys[2], 128, 128),
    ]
    wv, bv = _linear_params(keys[3], 128, vocab)
    return {
        "enc": {"layers": enc_layers, "wv": wv, "bv": bv},
        "mlp1": _linear_params(keys[4], 384, 256),
        "mlp2": _linear_params(keys[5], 256, 128),
        "out1": _linear_params(keys[6], 128, 1),
        "lt1": _linear_params(keys[7], 1, 64),
        "lt2": _linear_params(keys[8], 64, 128),
        "out2": _linear_params(keys[9], 128, 1),
    }


def synthetic_encoder(enc, node, edge):
    # Deterministic synthetic stand-in for the external pretrained encoder:
    # produces 'hidden_states' (3 x (2S, B, 128)) and 'logits' ((2S, 1, V)).
    x = jnp.concatenate([node, edge], axis=-1)           # (B, 2S, Dn+De)
    hidden_states = []
    for w, b in enc["layers"]:
        x = jnp.tanh(x @ w + b)
        hidden_states.append(jnp.swapaxes(x, 0, 1))      # (2S, B, 128)
    logits = hidden_states[-1][:, :1, :] @ enc["wv"] + enc["bv"]   # (2S, 1, V)
    return {"hidden_states": tuple(hidden_states), "logits": logits}


# ---------------------------------------------------------------------------
# Full forward, mirroring the PyTorch module
# ---------------------------------------------------------------------------
def pythia_ppi_logits_forward(params, wt_id, mt_id, node_in, edge_in,
                              batch_size=1):
    # node_in: (L, batch, 2, Dn), edge_in: (L, batch, 2, De)
    node_in = jnp.swapaxes(node_in, 0, 1)
    node = jnp.concatenate([node_in[:, :, 0, :], node_in[:, :, 1, :]], axis=1)
    edge_in = jnp.swapaxes(edge_in, 0, 1)
    edge = jnp.concatenate([edge_in[:, :, 0, :], edge_in[:, :, 1, :]], axis=1)

    output = synthetic_encoder(params["enc"], node, edge)
    h = output["hidden_states"]
    logits_full = output["logits"]                       # (2S, 1, V)
    shape = logits_full.shape[0] // 2

    wt_logits = logits_full[:shape, 0, :]                # (S, V)  == squeeze(1)
    mt_logits = logits_full[shape:, 0, :]

    hiddens = jnp.concatenate(
        [h[0].reshape(shape * 2, batch_size, 128),
         h[1].reshape(shape * 2, batch_size, 128),
         h[2].reshape(shape * 2, batch_size, 128)], axis=-1)   # (2S, B, 384)

    # Only batch index 0 of hiddens_out feeds the module outputs
    # (hiddens_out[:, 0, 0]); cast the MXU operand slab to bf16 once here.
    x = hiddens[:, 0, :].astype(jnp.bfloat16)            # (2S, 384) bf16
    hid_wt_x = x[:shape]                                 # (S, 384)
    hid_mt_x = x[shape:]                                 # (S, 384)

    (mw1, mb1), (mw2, mb2), (mw3, mb3) = (params["mlp1"], params["mlp2"],
                                          params["out1"])
    (lw1, lb1), (lw2, lb2), (lw3, lb3) = (params["lt1"], params["lt2"],
                                          params["out2"])

    # Exact algebraic folds (no nonlinearity between the folded layers).
    w_head_row = (mw2 @ mw3).reshape(1, 256).astype(jnp.bfloat16)  # mlp2∘out1
    # (mb2 @ mw3 + mb3) cancels in the mt - wt difference -> not needed.
    del mb2, mb3
    w_lt_row = (lw2 @ lw3).reshape(1, 64)                          # lt2∘out2
    b_lt = lb2 @ lw3 + lb3                                         # (1, 1)

    out, logits = fused_ppi_head_pallas(
        hid_wt_x, hid_mt_x, wt_logits, mt_logits, wt_id, mt_id,
        mw1.astype(jnp.bfloat16), mb1, w_head_row,
        lw1, lb1, w_lt_row, b_lt)
    return out, logits


# ---------------------------------------------------------------------------
# Pure-JAX f32 reference (numerical sanity check)
# ---------------------------------------------------------------------------
def reference_forward(params, wt_id, mt_id, node_in, edge_in, batch_size=1):
    node_in = jnp.swapaxes(node_in, 0, 1)
    node = jnp.concatenate([node_in[:, :, 0, :], node_in[:, :, 1, :]], axis=1)
    edge_in = jnp.swapaxes(edge_in, 0, 1)
    edge = jnp.concatenate([edge_in[:, :, 0, :], edge_in[:, :, 1, :]], axis=1)
    output = synthetic_encoder(params["enc"], node, edge)
    h = output["hidden_states"]
    logits_full = output["logits"]
    shape = logits_full.shape[0] // 2
    wt_logits = logits_full[:shape, 0, :]
    mt_logits = logits_full[shape:, 0, :]
    hiddens = jnp.concatenate(
        [h[i].reshape(shape * 2, batch_size, 128) for i in range(3)], axis=-1)
    (w1, b1), (w2, b2), (w3, b3) = params["mlp1"], params["mlp2"], params["out1"]
    ho = jnp.maximum(hiddens @ w1 + b1, 0.0) @ w2 + b2
    ho = ho @ w3 + b3
    hdiff = ho[shape:, 0, 0] - ho[:shape, 0, 0]
    s = (wt_logits * wt_id).sum(1) - (mt_logits * mt_id).sum(1)
    (lw1, lb1), (lw2, lb2), (lw3, lb3) = (params["lt1"], params["lt2"],
                                          params["out2"])
    g = s[:, None] * lw1 + lb1
    g = 0.5 * g * (1.0 + lax.erf(g * INV_SQRT2))
    g = g @ lw2 + lb2
    lg = (g @ lw3 + lb3)[:, 0]
    return hdiff + lg, lg


if __name__ == "__main__":
    key = jax.random.PRNGKey(0)
    L, B, Dn, De, V = 8, 1, 32, 16, 128          # seq=8, batch=1, vocab=128
    k_param, k_node, k_edge, k_wt, k_mt = jax.random.split(key, 5)

    params = init_params(k_param, Dn, De, V)
    node_in = jax.random.normal(k_node, (L, B, 2, Dn), jnp.float32)
    edge_in = jax.random.normal(k_edge, (L, B, 2, De), jnp.float32)
    wt_id = jax.random.normal(k_wt, (L, V), jnp.float32)
    mt_id = jax.random.normal(k_mt, (L, V), jnp.float32)

    fwd = jax.jit(pythia_ppi_logits_forward, static_argnames=("batch_size",))
    out, logits = fwd(params, wt_id, mt_id, node_in, edge_in, batch_size=B)
    jax.block_until_ready((out, logits))

    out_ref, logits_ref = reference_forward(params, wt_id, mt_id, node_in,
                                            edge_in, batch_size=B)
    assert out.shape == (L,) and logits.shape == (L,)
    # Tolerance loosened vs. pure-f32 because branch-1 MXU operands are bf16
    # (f32 accumulation); measured error is ~1e-3 absolute at these scales.
    assert bool(jnp.allclose(out, out_ref, rtol=1e-2, atol=1e-2))
    assert bool(jnp.allclose(logits, logits_ref, rtol=1e-2, atol=1e-2))
    print("KERNEL_OK")
</pallas_src>

<mosaic_0001>
module attributes {stable_mosaic.version = 11 : i64} {
  func.func @_fused_kernel(%arg0: i32, %arg1: memref<8x384xbf16, #tpu.memory_space<vmem>>, %arg2: memref<8x384xbf16, #tpu.memory_space<vmem>>, %arg3: memref<8x128xf32, #tpu.memory_space<vmem>>, %arg4: memref<8x128xf32, #tpu.memory_space<vmem>>, %arg5: memref<8x128xf32, #tpu.memory_space<vmem>>, %arg6: memref<8x128xf32, #tpu.memory_space<vmem>>, %arg7: memref<384x256xbf16, #tpu.memory_space<vmem>>, %arg8: memref<1x256xf32, #tpu.memory_space<vmem>>, %arg9: memref<1x256xbf16, #tpu.memory_space<vmem>>, %arg10: memref<1x64xf32, #tpu.memory_space<vmem>>, %arg11: memref<1x64xf32, #tpu.memory_space<vmem>>, %arg12: memref<1x64xf32, #tpu.memory_space<vmem>>, %arg13: memref<1x1xf32, #tpu.memory_space<smem>>, %arg14: memref<1x8xf32, #tpu.memory_space<vmem>>, %arg15: memref<1x8xf32, #tpu.memory_space<vmem>>) attributes {dimension_semantics = [#tpu.dimension_semantics<parallel>], iteration_bounds = array<i64: 1>, scalar_prefetch = 0 : i64, scratch_operands = 0 : i64, tpu.core_type = #tpu.core_type<tc>, window_params = [{transform_indices = @transform_0, window_bounds = array<i64: 8, 384>}, {transform_indices = @transform_1, window_bounds = array<i64: 8, 384>}, {transform_indices = @transform_2, window_bounds = array<i64: 8, 128>}, {transform_indices = @transform_3, window_bounds = array<i64: 8, 128>}, {transform_indices = @transform_4, window_bounds = array<i64: 8, 128>}, {transform_indices = @transform_5, window_bounds = array<i64: 8, 128>}, {pipeline_mode = #tpu.pipeline_mode<synchronous>, transform_indices = @transform_6, window_bounds = array<i64: 384, 256>}, {pipeline_mode = #tpu.pipeline_mode<synchronous>, transform_indices = @transform_7, window_bounds = array<i64: 1, 256>}, {pipeline_mode = #tpu.pipeline_mode<synchronous>, transform_indices = @transform_8, window_bounds = array<i64: 1, 256>}, {pipeline_mode = #tpu.pipeline_mode<synchronous>, transform_indices = @transform_9, window_bounds = array<i64: 1, 64>}, {pipeline_mode = #tpu.pipeline_mode<synchronous>, transform_indices = @transform_10, window_bounds = array<i64: 1, 64>}, {pipeline_mode = #tpu.pipeline_mode<synchronous>, transform_indices = @transform_11, window_bounds = array<i64: 1, 64>}, {transform_indices = @transform_12, window_bounds = array<i64: 1, 1>}, {transform_indices = @transform_13, window_bounds = array<i64: 1, 8>}, {transform_indices = @transform_14, window_bounds = array<i64: 1, 8>}]} {
    %c0 = arith.constant 0 : index
    %c0_0 = arith.constant 0 : index
    %0 = memref.load %arg13[%c0, %c0_0] : memref<1x1xf32, #tpu.memory_space<smem>>
    %c0_1 = arith.constant 0 : index
    %c0_2 = arith.constant 0 : index
    %1 = vector.load %arg2[%c0_1, %c0_2] : memref<8x384xbf16, #tpu.memory_space<vmem>>, vector<8x384xbf16>
    %c0_3 = arith.constant 0 : index
    %c0_4 = arith.constant 0 : index
    %2 = vector.load %arg7[%c0_3, %c0_4] : memref<384x256xbf16, #tpu.memory_space<vmem>>, vector<384x256xbf16>
    %cst = arith.constant dense<0.000000e+00> : vector<8x256xf32>
    %3 = tpu.matmul %1, %2, %cst {dimension_numbers = #tpu.dot_dimension_numbers<[1], [0], [0], [1], [0, 0, 1, 1], [], []>} : vector<8x384xbf16>, vector<384x256xbf16>, vector<8x256xf32> -> vector<8x256xf32>
    %c0_5 = arith.constant 0 : index
    %c0_6 = arith.constant 0 : index
    %4 = vector.load %arg8[%c0_5, %c0_6] : memref<1x256xf32, #tpu.memory_space<vmem>>, vector<1x256xf32>
    %5 = vector.broadcast %4 : vector<1x256xf32> to vector<8x256xf32>
    %6 = arith.addf %3, %5 : vector<8x256xf32>
    %cst_7 = arith.constant 0.000000e+00 : f32
    %7 = vector.broadcast %cst_7 : f32 to vector<8x256xf32>
    %8 = arith.maximumf %6, %7 : vector<8x256xf32>
    %c0_8 = arith.constant 0 : index
    %c0_9 = arith.constant 0 : index
    %9 = vector.load %arg1[%c0_8, %c0_9] : memref<8x384xbf16, #tpu.memory_space<vmem>>, vector<8x384xbf16>
    %c0_10 = arith.constant 0 : index
    %c0_11 = arith.constant 0 : index
    %10 = vector.load %arg7[%c0_10, %c0_11] : memref<384x256xbf16, #tpu.memory_space<vmem>>, vector<384x256xbf16>
    %cst_12 = arith.constant dense<0.000000e+00> : vector<8x256xf32>
    %11 = tpu.matmul %9, %10, %cst_12 {dimension_numbers = #tpu.dot_dimension_numbers<[1], [0], [0], [1], [0, 0, 1, 1], [], []>} : vector<8x384xbf16>, vector<384x256xbf16>, vector<8x256xf32> -> vector<8x256xf32>
    %c0_13 = arith.constant 0 : index
    %c0_14 = arith.constant 0 : index
    %12 = vector.load %arg8[%c0_13, %c0_14] : memref<1x256xf32, #tpu.memory_space<vmem>>, vector<1x256xf32>
    %13 = vector.broadcast %12 : vector<1x256xf32> to vector<8x256xf32>
    %14 = arith.addf %11, %13 : vector<8x256xf32>
    %cst_15 = arith.constant 0.000000e+00 : f32
    %15 = vector.broadcast %cst_15 : f32 to vector<8x256xf32>
    %16 = arith.maximumf %14, %15 : vector<8x256xf32>
    %17 = arith.subf %8, %16 : vector<8x256xf32>
    %18 = arith.truncf %17 : vector<8x256xf32> to vector<8x256xbf16>
    %c0_16 = arith.constant 0 : index
    %c0_17 = arith.constant 0 : index
    %19 = vector.load %arg9[%c0_16, %c0_17] : memref<1x256xbf16, #tpu.memory_space<vmem>>, vector<1x256xbf16>
    %cst_18 = arith.constant dense<0.000000e+00> : vector<1x8xf32>
    %20 = tpu.matmul %19, %18, %cst_18 {dimension_numbers = #tpu.dot_dimension_numbers<[1], [1], [0], [0], [0, 0, 1, 0], [], []>} : vector<1x256xbf16>, vector<8x256xbf16>, vector<1x8xf32> -> vector<1x8xf32>
    %c0_19 = arith.constant 0 : index
    %c0_20 = arith.constant 0 : index
    %21 = vector.load %arg3[%c0_19, %c0_20] : memref<8x128xf32, #tpu.memory_space<vmem>>, vector<8x128xf32>
    %c0_21 = arith.constant 0 : index
    %c0_22 = arith.constant 0 : index
    %22 = vector.load %arg5[%c0_21, %c0_22] : memref<8x128xf32, #tpu.memory_space<vmem>>, vector<8x128xf32>
    %23 = arith.mulf %21, %22 : vector<8x128xf32>
    %c0_23 = arith.constant 0 : index
    %c0_24 = arith.constant 0 : index
    %24 = vector.load %arg4[%c0_23, %c0_24] : memref<8x128xf32, #tpu.memory_space<vmem>>, vector<8x128xf32>
    %c0_25 = arith.constant 0 : index
    %c0_26 = arith.constant 0 : index
    %25 = vector.load %arg6[%c0_25, %c0_26] : memref<8x128xf32, #tpu.memory_space<vmem>>, vector<8x128xf32>
    %26 = arith.mulf %24, %25 : vector<8x128xf32>
    %27 = arith.subf %23, %26 : vector<8x128xf32>
    %cst_27 = arith.constant dense<0.000000e+00> : vector<8xf32>
    %28 = vector.multi_reduction <add>, %27, %cst_27 [1] : vector<8x128xf32> to vector<8xf32>
    %29 = vector.shape_cast %28 : vector<8xf32> to vector<8x1xf32>
    %c0_28 = arith.constant 0 : index
    %c0_29 = arith.constant 0 : index
    %30 = vector.load %arg10[%c0_28, %c0_29] : memref<1x64xf32, #tpu.memory_space<vmem>>, vector<1x64xf32>
    %31 = vector.broadcast %29 : vector<8x1xf32> to vector<8x64xf32>
    %32 = vector.broadcast %30 : vector<1x64xf32> to vector<8x64xf32>
    %33 = arith.mulf %31, %32 : vector<8x64xf32>
    %c0_30 = arith.constant 0 : index
    %c0_31 = arith.constant 0 : index
    %34 = vector.load %arg11[%c0_30, %c0_31] : memref<1x64xf32, #tpu.memory_space<vmem>>, vector<1x64xf32>
    %35 = vector.broadcast %34 : vector<1x64xf32> to vector<8x64xf32>
    %36 = arith.addf %33, %35 : vector<8x64xf32>
    %cst_32 = arith.constant 5.000000e-01 : f32
    %37 = vector.broadcast %cst_32 : f32 to vector<8x64xf32>
    %38 = arith.mulf %37, %36 : vector<8x64xf32>
    %cst_33 = arith.constant 0.707106769 : f32
    %39 = vector.broadcast %cst_33 : f32 to vector<8x64xf32>
    %40 = arith.mulf %36, %39 : vector<8x64xf32>
    %41 = math.erf %40 : vector<8x64xf32>
    %cst_34 = arith.constant 1.000000e+00 : f32
    %42 = vector.broadcast %cst_34 : f32 to vector<8x64xf32>
    %43 = arith.addf %42, %41 : vector<8x64xf32>
    %44 = arith.mulf %38, %43 : vector<8x64xf32>
    %c0_35 = arith.constant 0 : index
    %c0_36 = arith.constant 0 : index
    %45 = vector.load %arg12[%c0_35, %c0_36] : memref<1x64xf32, #tpu.memory_space<vmem>>, vector<1x64xf32>
    %cst_37 = arith.constant dense<0.000000e+00> : vector<1x8xf32>
    %46 = tpu.matmul %45, %44, %cst_37 {dimension_numbers = #tpu.dot_dimension_numbers<[1], [1], [0], [0], [0, 0, 1, 0], [], []>} : vector<1x64xf32>, vector<8x64xf32>, vector<1x8xf32> -> vector<1x8xf32>
    %47 = vector.broadcast %0 : f32 to vector<1x8xf32>
    %48 = arith.addf %46, %47 : vector<1x8xf32>
    %c0_38 = arith.constant 0 : index
    %c0_39 = arith.constant 0 : index
    %49 = vector.load %arg15[%c0_38, %c0_39] : memref<1x8xf32, #tpu.memory_space<vmem>>, vector<1x8xf32>
    tpu.vector_store %arg15[%c0_38, %c0_39], %48 {strides = array<i32>} : memref<1x8xf32, #tpu.memory_space<vmem>>, vector<1x8xf32>,
    %50 = arith.addf %20, %48 : vector<1x8xf32>
    %c0_40 = arith.constant 0 : index
    %c0_41 = arith.constant 0 : index
    %51 = vector.load %arg14[%c0_40, %c0_41] : memref<1x8xf32, #tpu.memory_space<vmem>>, vector<1x8xf32>
    tpu.vector_store %arg14[%c0_40, %c0_41], %50 {strides = array<i32>} : memref<1x8xf32, #tpu.memory_space<vmem>>, vector<1x8xf32>,
    return
  }
  func.func @transform_0(%arg0: i32) -> (i32, i32) {
    %c0_i32 = arith.constant 0 : i32
    %c0_i32_0 = arith.constant 0 : i32
    return %arg0, %c0_i32 : i32, i32
  }
  func.func @transform_1(%arg0: i32) -> (i32, i32) {
    %c0_i32 = arith.constant 0 : i32
    %c0_i32_0 = arith.constant 0 : i32
    return %arg0, %c0_i32 : i32, i32
  }
  func.func @transform_2(%arg0: i32) -> (i32, i32) {
    %c0_i32 = arith.constant 0 : i32
    %c0_i32_0 = arith.constant 0 : i32
    return %arg0, %c0_i32 : i32, i32
  }
  func.func @transform_3(%arg0: i32) -> (i32, i32) {
    %c0_i32 = arith.constant 0 : i32
    %c0_i32_0 = arith.constant 0 : i32
    return %arg0, %c0_i32 : i32, i32
  }
  func.func @transform_4(%arg0: i32) -> (i32, i32) {
    %c0_i32 = arith.constant 0 : i32
    %c0_i32_0 = arith.constant 0 : i32
    return %arg0, %c0_i32 : i32, i32
  }
  func.func @transform_5(%arg0: i32) -> (i32, i32) {
    %c0_i32 = arith.constant 0 : i32
    %c0_i32_0 = arith.constant 0 : i32
    return %arg0, %c0_i32 : i32, i32
  }
  func.func @transform_6(%arg0: i32) -> (i32, i32) {
    %c0_i32 = arith.constant 0 : i32
    %c0_i32_0 = arith.constant 0 : i32
    %c0_i32_1 = arith.constant 0 : i32
    return %c0_i32, %c0_i32_0 : i32, i32
  }
  func.func @transform_7(%arg0: i32) -> (i32, i32) {
    %c0_i32 = arith.constant 0 : i32
    %c0_i32_0 = arith.constant 0 : i32
    %c0_i32_1 = arith.constant 0 : i32
    return %c0_i32, %c0_i32_0 : i32, i32
  }
  func.func @transform_8(%arg0: i32) -> (i32, i32) {
    %c0_i32 = arith.constant 0 : i32
    %c0_i32_0 = arith.constant 0 : i32
    %c0_i32_1 = arith.constant 0 : i32
    return %c0_i32, %c0_i32_0 : i32, i32
  }
  func.func @transform_9(%arg0: i32) -> (i32, i32) {
    %c0_i32 = arith.constant 0 : i32
    %c0_i32_0 = arith.constant 0 : i32
    %c0_i32_1 = arith.constant 0 : i32
    return %c0_i32, %c0_i32_0 : i32, i32
  }
  func.func @transform_10(%arg0: i32) -> (i32, i32) {
    %c0_i32 = arith.constant 0 : i32
    %c0_i32_0 = arith.constant 0 : i32
    %c0_i32_1 = arith.constant 0 : i32
    return %c0_i32, %c0_i32_0 : i32, i32
  }
  func.func @transform_11(%arg0: i32) -> (i32, i32) {
    %c0_i32 = arith.constant 0 : i32
    %c0_i32_0 = arith.constant 0 : i32
    %c0_i32_1 = arith.constant 0 : i32
    return %c0_i32, %c0_i32_0 : i32, i32
  }
  func.func @transform_12(%arg0: i32) -> (i32, i32) {
    %c0_i32 = arith.constant 0 : i32
    %c0_i32_0 = arith.constant 0 : i32
    %c0_i32_1 = arith.constant 0 : i32
    return %c0_i32, %c0_i32_0 : i32, i32
  }
  func.func @transform_13(%arg0: i32) -> (i32, i32) {
    %c0_i32 = arith.constant 0 : i32
    %c0_i32_0 = arith.constant 0 : i32
    return %c0_i32, %arg0 : i32, i32
  }
  func.func @transform_14(%arg0: i32) -> (i32, i32) {
    %c0_i32 = arith.constant 0 : i32
    %c0_i32_0 = arith.constant 0 : i32
    return %c0_i32, %arg0 : i32, i32
  }
}

</mosaic_0001>

<bundles_post_ra>
// kernel: pythia_ppi_logits_forward.1
= control target key start
LH: loop header
LB: loop body
LE: loop exit
PB: predicated region body
PF: predicated region fallthrough
CT: control target
= control target key end

     0   :  { %21 = vsyncpa [#allocation4], 0  ;;  %v951_v2 = vmov 0   ;;  %s1380_s0 = inlined_call_operand.vmem [shape: bf16[8,384], index: 0, kind: input, shape index: {}]   ;;  %s1381_s1 = inlined_call_operand.vmem [shape: bf16[8,384], index: 1, kind: input, shape index: {}]   ;;  %s1382_s2 = inlined_call_operand.vmem [shape: f32[8,128], index: 2, kind: input, shape index: {}]   ;;  %s1383_s3 = inlined_call_operand.vmem [shape: f32[8,128], index: 3, kind: input, shape index: {}]   ;;  %s1384_s4 = inlined_call_operand.vmem [shape: f32[8,128], index: 4, kind: input, shape index: {}]   ;;  %s1385_s5 = inlined_call_operand.vmem [shape: f32[8,128], index: 5, kind: input, shape index: {}]   ;;  %s1386_s6 = inlined_call_operand.vmem [shape: bf16[384,256], index: 6, kind: input, shape index: {}]   ;;  %s1387_s7 = inlined_call_operand.vmem [shape: f32[1,256], index: 7, kind: input, shape index: {}]   ;;  %s1388_s8 = inlined_call_operand.vmem [shape: bf16[1,256], index: 8, kind: input, shape index: {}]   ;;  %s1389_s9 = inlined_call_operand.vmem [shape: f32[1,64], index: 9, kind: input, shape index: {}]   ;;  %s1390_s10 = inlined_call_operand.vmem [shape: f32[1,64], index: 10, kind: input, shape index: {}]   ;;  %s1391_s11 = inlined_call_operand.vmem [shape: f32[1,64], index: 11, kind: input, shape index: {}]   ;;  %s1392_s12 = inlined_call_operand.<no memory space> [shape: f32[1,1], index: 12, kind: input, shape index: {}]   ;;  %s1393_s13 = inlined_call_operand.hbm [shape: f32[1,8], index: 13, kind: output, shape index: {0}]   ;;  %s1394_s14 = inlined_call_operand.hbm [shape: f32[1,8], index: 14, kind: output, shape index: {1}]  }
   0x1   :  { %v1035_v0 = vld [vmem:[%s1386_s6 + $0x74] ss:$8 sps:$4 sm:$0xff]   ;;  %437 = vmatprep.mubr.bf16.mxu1 %v951_v2  ;;  %v1047_v3 = vld [vmem:[%s1386_s6 + $0x70] ss:$8 sps:$4 sm:$0xff]   ;;  %v1058_v5 = vld [vmem:[%s1386_s6 + $0x64] ss:$8 sps:$4 sm:$0xff]  }
   0x2   :  { %v1040_v1 = vld [vmem:[%s1386_s6 + $0x174] ss:$8 sps:$4 sm:$0xff]   ;;  %364 = vmatprep.subr.bf16.mxu0 %v1035_v0  ;;  %v1052_v4 = vld [vmem:[%s1386_s6 + $0x170] ss:$8 sps:$4 sm:$0xff]   ;;  %v1065_v6 = vld [vmem:[%s1386_s6 + $0x164] ss:$8 sps:$4 sm:$0xff]  }
   0x3   :  { %405 = vmatprep.subr.bf16.mxu1 %v1040_v1  ;;  %365 = vmatpush1.bf16.msra.mxu0 %v1047_v3  ;;  %v1070_v7 = vld [vmem:[%s1386_s6 + $0x60] ss:$8 sps:$4 sm:$0xff]   ;;  %v1082_v9 = vld [vmem:[%s1386_s6 + $0x54] ss:$8 sps:$4 sm:$0xff]   ;;  %v1092_v11 = vld [vmem:[%s1386_s6 + $0x50] ss:$8 sps:$4 sm:$0xff]  }
   0x4   :  { %406 = vmatpush1.bf16.msra.mxu1 %v1052_v4  ;;  %366 = vmatprep.subr.bf16.mxu0 %v1058_v5  ;;  %v1076_v8 = vld [vmem:[%s1386_s6 + $0x160] ss:$8 sps:$4 sm:$0xff]   ;;  %v1087_v10 = vld [vmem:[%s1386_s6 + $0x154] ss:$8 sps:$4 sm:$0xff]   ;;  %v1097_v12 = vld [vmem:[%s1386_s6 + $0x150] ss:$8 sps:$4 sm:$0xff]  }
   0x5   :  { %407 = vmatprep.subr.bf16.mxu1 %v1065_v6  ;;  %v1104_v13 = vld [vmem:[%s1386_s6 + $0x44] ss:$8 sps:$4 sm:$0xff]   ;;  %v1116_v15 = vld [vmem:[%s1386_s6 + $0x40] ss:$8 sps:$4 sm:$0xff]   ;;  %v1128_v17 = vld [vmem:[%s1386_s6 + $0x34] ss:$8 sps:$4 sm:$0xff]  }
   0x6   :  { %v1111_v14 = vld [vmem:[%s1386_s6 + $0x144] ss:$8 sps:$4 sm:$0xff]   ;;  %v1123_v16 = vld [vmem:[%s1386_s6 + $0x140] ss:$8 sps:$4 sm:$0xff]   ;;  %v1135_v18 = vld [vmem:[%s1386_s6 + $0x134] ss:$8 sps:$4 sm:$0xff]  }
   0x7   :  { %367 = vmatpush1.bf16.msra.mxu0 %v1070_v7  ;;  %v1140_v19 = vld [vmem:[%s1386_s6 + $0x30] ss:$8 sps:$4 sm:$0xff]   ;;  %v1152_v21 = vld [vmem:[%s1386_s6 + $0x24] ss:$8 sps:$4 sm:$0xff]   ;;  %v1164_v23 = vld [vmem:[%s1386_s6 + $0x20] ss:$8 sps:$4 sm:$0xff]  }
   0x8   :  { %408 = vmatpush1.bf16.msra.mxu1 %v1076_v8  ;;  %368 = vmatprep.subr.bf16.mxu0 %v1082_v9  ;;  %v1145_v20 = vld [vmem:[%s1386_s6 + $0x130] ss:$8 sps:$4 sm:$0xff]   ;;  %v1159_v22 = vld [vmem:[%s1386_s6 + $0x124] ss:$8 sps:$4 sm:$0xff]   ;;  %v1171_v24 = vld [vmem:[%s1386_s6 + $0x120] ss:$8 sps:$4 sm:$0xff]  }
   0x9   :  { %409 = vmatprep.subr.bf16.mxu1 %v1087_v10  ;;  %v1176_v25 = vld [vmem:[%s1386_s6 + $0x14] ss:$8 sps:$4 sm:$0xff]   ;;  %v1190_v27 = vld [vmem:[%s1386_s6 + $0x10] ss:$8 sps:$4 sm:$0xff]   ;;  %v1202_v29 = vld [vmem:[%s1386_s6 + $0x4] ss:$8 sps:$4 sm:$0xff]  }
   0xa   :  { %v1183_v26 = vld [vmem:[%s1386_s6 + $0x114] ss:$8 sps:$4 sm:$0xff]   ;;  %v1195_v28 = vld [vmem:[%s1386_s6 + $0x110] ss:$8 sps:$4 sm:$0xff]   ;;  %v1207_v30 = vld [vmem:[%s1386_s6 + $0x104] ss:$8 sps:$4 sm:$0xff]  }
   0xb   :  { %369 = vmatpush1.bf16.msra.mxu0 %v1092_v11  ;;  %v1214_v31 = vld [vmem:[%s1386_s6] ss:$8 sps:$4 sm:$0xff]   ;;  %v1226_v33 = vld [vmem:[%s1386_s6 + $0xf4] ss:$8 sps:$4 sm:$0xff]   ;;  %v1236_v35 = vld [vmem:[%s1386_s6 + $0xf0] ss:$8 sps:$4 sm:$0xff]  }
   0xc   :  { %410 = vmatpush1.bf16.msra.mxu1 %v1097_v12  ;;  %370 = vmatprep.subr.bf16.mxu0 %v1104_v13  ;;  %v1219_v32 = vld [vmem:[%s1386_s6 + $0x100] ss:$8 sps:$4 sm:$0xff]   ;;  %v1248_v37 = vld [vmem:[%s1386_s6 + $0xe4] ss:$8 sps:$4 sm:$0xff]  }
   0xd   :  { %411 = vmatprep.subr.bf16.mxu1 %v1111_v14  ;;  %v877_v34 = vld [vmem:[%s1381_s1 + $0x8] ss:$0 sps:$4 sm:$0xff]   ;;  %v1241_v36 = vld [vmem:[%s1381_s1] sm:$0xff] }
   0xe   :  { %v756_v38 = vcombine.high %v1241_v36, %v1241_v36  ;;  %v1255_v39 = vld [vmem:[%s1380_s0] sm:$0xff] }
   0xf   :  { %371 = vmatpush1.bf16.msra.mxu0 %v1116_v15  ;;  %v807_v40 = vcombine.high %v1255_v39, %v1255_v39  ;;  %v550_v41 = vld [vmem:[%s1382_s2] sm:$0xff] }
  0x10   :  { %412 = vmatpush1.bf16.msra.mxu1 %v1123_v16  ;;  %372 = vmatprep.subr.bf16.mxu0 %v1128_v17  ;;  %v551_v42 = vld [vmem:[%s1384_s4] sm:$0xff] }
  0x11   :  { %413 = vmatprep.subr.bf16.mxu1 %v1135_v18  ;;  %v553_v43 = vld [vmem:[%s1383_s3] sm:$0xff]  ;;  %396 = vmatprep.mubr.bf16.mxu0 %v756_v38  ;;  %v552_v44 = vmul.f32 %v551_v42, %v550_v41 }
  0x12   :  { %v554_v45 = vld [vmem:[%s1385_s5] sm:$0xff] }
  0x13   :  { %373 = vmatpush1.bf16.msra.mxu0 %v1140_v19 }
  0x14   :  { %414 = vmatpush1.bf16.msra.mxu1 %v1145_v20  ;;  %374 = vmatprep.subr.bf16.mxu0 %v1152_v21 }
  0x15   :  { %415 = vmatprep.subr.bf16.mxu1 %v1159_v22 }
  0x17   :  { %375 = vmatpush1.bf16.msra.mxu0 %v1164_v23 }
  0x18   :  { %416 = vmatpush1.bf16.msra.mxu1 %v1171_v24  ;;  %376 = vmatprep.subr.bf16.mxu0 %v1176_v25 }
  0x19   :  { %417 = vmatprep.subr.bf16.mxu1 %v1183_v26 }
  0x1b   :  { %377 = vmatpush1.bf16.msra.mxu0 %v1190_v27 }
  0x1c   :  { %418 = vmatpush1.bf16.msra.mxu1 %v1195_v28  ;;  %378 = vmatprep.subr.bf16.mxu0 %v1202_v29 }
  0x1d   :  { %419 = vmatprep.subr.bf16.mxu1 %v1207_v30 }
  0x1f   :  { %379 = vmatpush1.bf16.msra.mxu0 %v1214_v31 }
  0x20   :  { %420 = vmatpush1.bf16.msra.mxu1 %v1219_v32  ;;  %380 = vmatprep.subr.bf16.mxu0 %v1226_v33 }
  0x21   :  { %461 = vmatprep.subr.bf16.mxu1 %v1035_v0 }
  0x23   :  { %438 = vmatmul.mubr.bf16.vlgmr.msra.gmra.mxu1 %v877_v34 }
  0x24   :  { %22 = vsyncpa [#allocation6], 0  ;;  %381 = vmatpush2.bf16.msra.mxu0 %v1236_v35  ;;  %462 = vmatpush1.bf16.msra.mxu1 %v1047_v3  ;;  %v881_v46 = vld [vmem:[%s1386_s6 + $0xe0] ss:$8 sps:$4 sm:$0xff]   ;;  %v555_v47 = vmul.f32 %v554_v45, %v553_v43  ;;  %v882_v48 = vld [vmem:[%s1386_s6 + $0xd4] ss:$8 sps:$4 sm:$0xff]   ;;  %v755_v61 = vcombine.low %v1241_v36, %v1241_v36  ;;  %v806_v62 = vcombine.low %v1255_v39, %v1255_v39 }
  0x25   :  { %382 = vmatprep.subr.bf16.mxu0 %v1248_v37  ;;  %463 = vmatprep.subr.bf16.mxu1 %v1058_v5  ;;  %v884_v50 = vld [vmem:[%s1386_s6 + $0xd0] ss:$8 sps:$4 sm:$0xff]   ;;  %v885_v51 = vld [vmem:[%s1386_s6 + $0xc4] ss:$8 sps:$4 sm:$0xff]   ;;  %v887_v52 = vld [vmem:[%s1386_s6 + $0xc0] ss:$8 sps:$4 sm:$0xff]  }
  0x26   :  { %493 = vmatprep.mubr.bf16.mxu1 %v807_v40  ;;  %v556_v49 = vsub.f32 %v552_v44, %v555_v47  ;;  %v888_v53 = vld [vmem:[%s1386_s6 + $0xb4] ss:$8 sps:$4 sm:$0xff]   ;;  %v890_v54 = vld [vmem:[%s1386_s6 + $0xb0] ss:$8 sps:$4 sm:$0xff]   ;;  %v891_v55 = vld [vmem:[%s1386_s6 + $0xa4] ss:$8 sps:$4 sm:$0xff]  }
  0x27   :  { %v893_v56 = vld [vmem:[%s1386_s6 + $0xa0] ss:$8 sps:$4 sm:$0xff]   ;;  %v894_v57 = vld [vmem:[%s1386_s6 + $0x94] ss:$8 sps:$4 sm:$0xff]   ;;  %v896_v58 = vld [vmem:[%s1386_s6 + $0x90] ss:$8 sps:$4 sm:$0xff]  }
  0x28   :  { %383 = vmatpush2.bf16.msra.mxu0 %v881_v46  ;;  %464 = vmatpush1.bf16.msra.mxu1 %v1070_v7  ;;  %v897_v59 = vld [vmem:[%s1386_s6 + $0x84] ss:$8 sps:$4 sm:$0xff]   ;;  %v899_v60 = vld [vmem:[%s1386_s6 + $0x80] ss:$8 sps:$4 sm:$0xff]   ;;  %v952_v0 = vmov 0.0   ;;  %vm954_vm0 = vmmov 0  }
  0x29   :  { %384 = vmatprep.subr.bf16.mxu0 %v882_v48  ;;  %465 = vmatprep.subr.bf16.mxu1 %v1082_v9  ;;  %v904_v63 = vld [vmem:[%s1380_s0 + $0x8] ss:$0 sps:$4 sm:$0xff]   ;;  %v809_v5 = vld [vmem:[%s1389_s9] ss:$0 sm:$0xff]  ;;  %vm582_vm1 = vcmask 523264   ;;  %s955_s24 = smov [#allocation5]  }
  0x2a   :  { %557 = vadd.xlane.f32.xlu0 %v556_v49  ;;  %v813_v7 = vld.sshfl [vmem:[%s1388_s8] sm:$0x11 pattern:$0x75316420]  ;;  %s743_s1 = sshll.u32 %s955_s24, 4  ;;  %vm659_vm2 = vcmask 57344   ;;  %s744_s1 = int_to_ptr.vmem [resolvable:$true] %s743_s1 }
  0x2b   :  { %v810_v9 = vld [vmem:[%s1390_s10] ss:$0 sm:$0xff]  ;;  %s907_s25 = scalar_lea.vmem %s744_s1, 16  ;;  %s911_s26 = scalar_lea.vmem %s744_s1, 32 }
  0x2c   :  { %385 = vmatpush2.bf16.msra.mxu0 %v884_v50  ;;  %466 = vmatpush1.bf16.msra.mxu1 %v1092_v11  ;;  %p908_p0 = scmp.ne.s32.totalorder %s744_s1, %s907_s25  ;;  %p912_p1 = scmp.lt.s32.totalorder %s744_s1, %s744_s1 }
  0x2d   :  { %386 = vmatprep.subr.bf16.mxu0 %v885_v51  ;;  %467 = vmatprep.subr.bf16.mxu1 %v1104_v13  ;;  %p913_p2 = scmp.lt.s32.totalorder %s911_s26, %s907_s25 }
  0x2f   :  { %p914_p3 = por %p913_p2, %p912_p1 }
  0x30   :  { %387 = vmatpush2.bf16.msra.mxu0 %v887_v52  ;;  %468 = vmatpush1.bf16.msra.mxu1 %v1116_v15 }
  0x31   :  { %388 = vmatprep.subr.bf16.mxu0 %v888_v53  ;;  %469 = vmatprep.subr.bf16.mxu1 %v1128_v17  ;;  %p915_p4 = pnand %p914_p3, %p908_p0 }
  0x34   :  { %389 = vmatpush2.bf16.msra.mxu0 %v890_v54  ;;  %470 = vmatpush1.bf16.msra.mxu1 %v1140_v19 }
  0x35   :  { %390 = vmatprep.subr.bf16.mxu0 %v891_v55  ;;  %471 = vmatprep.subr.bf16.mxu1 %v1152_v21  ;;  %v580_v21 = vld [vmem:[%s1391_s11] sm:$0x1] }
  0x38   :  { %391 = vmatpush2.bf16.msra.mxu0 %v893_v56  ;;  %472 = vmatpush1.bf16.msra.mxu1 %v1164_v23 }
  0x39   :  { %392 = vmatprep.subr.bf16.mxu0 %v894_v57  ;;  %473 = vmatprep.subr.bf16.mxu1 %v1176_v25 }
  0x3c   :  { %393 = vmatpush2.bf16.msra.mxu0 %v896_v58  ;;  %474 = vmatpush1.bf16.msra.mxu1 %v1190_v27 }
  0x3d   :  { %394 = vmatprep.subr.bf16.mxu0 %v897_v59  ;;  %475 = vmatprep.subr.bf16.mxu1 %v1202_v29 }
  0x40   :  { %395 = vmatpush2.bf16.msra.mxu0 %v899_v60  ;;  %476 = vmatpush1.bf16.msra.mxu1 %v1214_v31  ;;  %v101_v31 = vld [vmem:[%s1387_s7] sm:$0x3] }
  0x41   :  { %477 = vmatprep.subr.bf16.mxu1 %v1226_v33  ;;  %502 = vmatprep.subr.bf16.mxu0 %v1040_v1  ;;  %v103_v1 = vlaneseq }
  0x43   :  { %397 = vmatmul.mubr.bf16.vlgmr.msra.gmra.mxu0 %v755_v61 }
  0x44   :  { %478 = vmatpush2.bf16.msra.mxu1 %v1236_v35  ;;  %503 = vmatpush1.bf16.msra.mxu0 %v1052_v4  ;;  %v104_v4 = vshrl.u32 %v103_v1, 7 }
  0x45   :  { %479 = vmatprep.subr.bf16.mxu1 %v1248_v37  ;;  %504 = vmatprep.subr.bf16.mxu0 %v1065_v6 }
  0x46   :  { %534 = vmatprep.mubr.bf16.mxu0 %v951_v2  ;;  %v953_v2 = vmov 1966171168  }
  0x47   :  { %v671_v3 = vunpack.c.l.s4 %v953_v2 }
  0x48   :  { %480 = vmatpush2.bf16.msra.mxu1 %v881_v46  ;;  %505 = vmatpush1.bf16.msra.mxu0 %v1076_v8 }
  0x49   :  { %481 = vmatprep.subr.bf16.mxu1 %v882_v48  ;;  %506 = vmatprep.subr.bf16.mxu0 %v1087_v10  ;;  %v672_v6 = vunpack.c.0.s8 %v671_v3  ;;  %v669_v10 = vcombine.high %v813_v7, %v813_v7 }
  0x4b   :  { %v675_v11 = vsub.s32 %v672_v6, %v104_v4 }
  0x4c   :  { %482 = vmatpush2.bf16.msra.mxu1 %v884_v50  ;;  %507 = vmatpush1.bf16.msra.mxu0 %v1097_v12 }
  0x4d   :  { %483 = vmatprep.subr.bf16.mxu1 %v885_v51  ;;  %508 = vmatprep.subr.bf16.mxu0 %v1111_v14  ;;  %v683_v13 = vrot.slane %v669_v10, %v675_v11  ;;  %v676_v14 = vrot.slane %v813_v7, %v675_v11 }
  0x50   :  { %484 = vmatpush2.bf16.msra.mxu1 %v887_v52  ;;  %509 = vmatpush1.bf16.msra.mxu0 %v1123_v16 }
  0x51   :  { %485 = vmatprep.subr.bf16.mxu1 %v888_v53  ;;  %510 = vmatprep.subr.bf16.mxu0 %v1135_v18 }
  0x54   :  { %486 = vmatpush2.bf16.msra.mxu1 %v890_v54  ;;  %511 = vmatpush1.bf16.msra.mxu0 %v1145_v20 }
  0x55   :  { %487 = vmatprep.subr.bf16.mxu1 %v891_v55  ;;  %512 = vmatprep.subr.bf16.mxu0 %v1159_v22 }
  0x58   :  { %488 = vmatpush2.bf16.msra.mxu1 %v893_v56  ;;  %513 = vmatpush1.bf16.msra.mxu0 %v1171_v24 }
  0x59   :  { %489 = vmatprep.subr.bf16.mxu1 %v894_v57  ;;  %514 = vmatprep.subr.bf16.mxu0 %v1183_v26 }
  0x5c   :  { %490 = vmatpush2.bf16.msra.mxu1 %v896_v58  ;;  %515 = vmatpush1.bf16.msra.mxu0 %v1195_v28 }
  0x5d   :  { %491 = vmatprep.subr.bf16.mxu1 %v897_v59  ;;  %516 = vmatprep.subr.bf16.mxu0 %v1207_v30  ;;  %v105_v30 = vsub.s32 0, %v104_v4  ;;  %v581_v59 = vstv %s1392_s12 }
  0x5f   :  { %v106_v33 = vrot.slane %v101_v31, %v105_v30 }
  0x60   :  { %492 = vmatpush2.bf16.msra.mxu1 %v899_v60  ;;  %517 = vmatpush1.bf16.msra.mxu0 %v1219_v32  ;;  %v109_v32 = vsub.s32 1, %v104_v4 }
  0x61   :  { %816 = vmatprep.subr.mxu0 %v952_v0 }
  0x62   :  { %v110_v34 = vrot.slane %v101_v31, %v109_v32 }
  0x63   :  { %494 = vmatmul.mubr.bf16.vlgmr.msra.gmra.mxu1 %v806_v62  ;;  %535 = vmatmul.mubr.bf16.vlgmr.msra.gmra.mxu0 %v904_v63 }
  0x64   :  { %818 = vmatprep.mubr.msk.f32.mxu0 %vm954_vm0, %v952_v0  ;;  %718 = vmatprep.mubr.bf16.mxu1 %v683_v13 }
  0xb3   :  { %v558_v8 = vpop.xlane.xlu0 %557 }
  0xb4   :  { %v566_v12 = vmul.f32 %v809_v5, %v558_v8 }
  0xb6   :  { %v574_v15 = vadd.f32 %v810_v9, %v566_v12 }
  0xb8   :  { %v576_v16 = vmul.f32 0.70710677, %v574_v15  ;;  %v575_v17 = vmul.f32 0.5, %v574_v15 }
  0xba   :  { %905 = verf.f32 %v576_v16 }
  0xc7   :  { %v906_v18 = vpop.eup %905 }
  0xc8   :  { %v578_v19 = vadd.f32 1.0, %v906_v18 }
  0xca   :  { %v579_v20 = vmul.f32 %v578_v19, %v575_v17 }
  0xcc   :  { %817 = vmatpush3.xpose.msk.msra.mxu0 %vm582_vm1, %v579_v20 }
  0xcf   :  { %819 = vmatmul.mubr.msk.f32.vlgmr.msra.gmra.mxu0 %vm582_vm1, %v580_v21 }
  0xe3   :  { %v439_v22 = vpop.f32.mrf.mxu1 }
  0xe5   :  { %v441_v23 = vpop.f32.mrf.mxu1 }
  0xe7   :  { %v443_v24 = vpop.f32.mrf.mxu1 }
  0xe9   :  { %v444_v25 = vpop.f32.mrf.mxu1 }
 0x103   :  { %v398_v26 = vpop.f32.mrf.mxu0 }
 0x104   :  { %v399_v35 = vadd.f32 %v398_v26, %v106_v33 }
 0x105   :  { %v400_v27 = vpop.f32.mrf.mxu0 }
 0x106   :  { %v401_v36 = vadd.f32 %v400_v27, %v110_v34  ;;  %v440_v40 = vadd.f32 %v439_v22, %v399_v35 }
 0x107   :  { %v402_v28 = vpop.f32.mrf.mxu0 }
 0x108   :  { %v442_v43 = vadd.f32 %v441_v23, %v401_v36  ;;  %v446_v50 = vmax.f32 %v440_v40, 0.0 }
 0x109   :  { %v403_v29 = vpop.f32.mrf.mxu0 }
 0x10a   :  { %v447_v53 = vmax.f32 %v442_v43, 0.0 }
 0x123   :  { %v495_v37 = vpop.f32.mrf.mxu1  ;;  %v536_v38 = vpop.f32.mrf.mxu0 }
 0x124   :  { %v496_v39 = vadd.f32 %v495_v37, %v106_v33 }
 0x125   :  { %v497_v41 = vpop.f32.mrf.mxu1  ;;  %v538_v42 = vpop.f32.mrf.mxu0 }
 0x126   :  { %v537_v44 = vadd.f32 %v536_v38, %v496_v39  ;;  %v498_v45 = vadd.f32 %v497_v41, %v110_v34 }
 0x127   :  { %v499_v46 = vpop.f32.mrf.mxu1  ;;  %v540_v47 = vpop.f32.mrf.mxu0 }
 0x128   :  { %v543_v48 = vmax.f32 %v537_v44, 0.0  ;;  %v539_v49 = vadd.f32 %v538_v42, %v498_v45 }
 0x129   :  { %v500_v51 = vpop.f32.mrf.mxu1  ;;  %v541_v52 = vpop.f32.mrf.mxu0 }
 0x12a   :  { %v544_v54 = vmax.f32 %v539_v49, 0.0  ;;  %v545_v55 = vsub.f32 %v446_v50, %v543_v48 }
 0x12c   :  { %v546_v56 = vsub.f32 %v447_v53, %v544_v54  ;;  %v547_v58 = vpack.c.bf16 %v545_v55, %v545_v55 }
 0x12e   :  { %v548_v57 = vpack.c.bf16 %v546_v56, %v546_v56 }
 0x130   :  { %700 = vmatprep.subr.bf16.mxu1 %v548_v57 }
 0x131   :  { %701 = vmatpush1.bf16.xpose.msra.mxu1 %v547_v58 }
 0x138   :  { %719 = vmatmul.mubr.bf16.vlgmr.msra.gmra.mxu1 %v676_v14 }
 0x18f   :  { %v655_v60 = vpop.f32.mrf.mxu0 }
 0x190   :  { %v656_v61 = vadd.f32 %v655_v60, %v581_v59 }
 0x191   :  { %v820_v62 = vpop.f32.mrf.mxu0 }
 0x192   :  { %660 = vst.msk [vmem:[#allocation5] sm:$0x1] %vm659_vm2, %v656_v61 }
 0x193   :  { %918 = shalt.err (!%p915_p4)
}
 0x194   :  { %746 = dma.vmem_to_hbm [thread:$0]  %s744_s1, 16, %s1394_s14, [#allocation6]  }
 0x195   :  { %s956_s12 = smov [#allocation3]  }
 0x196   :  { %s733_s29 = sshll.u32 %s956_s12, 4  ;;  %s734_s29 = int_to_ptr.vmem [resolvable:$true] %s733_s29 }
 0x197   :  { %s927_s30 = scalar_lea.vmem %s734_s29, 16  ;;  %s931_s15 = scalar_lea.vmem %s734_s29, 32 }
 0x198   :  { %p928_p5 = scmp.ne.s32.totalorder %s734_s29, %s927_s30  ;;  %p932_p6 = scmp.lt.s32.totalorder %s734_s29, %s734_s29 }
 0x199   :  { %p933_p7 = scmp.lt.s32.totalorder %s931_s15, %s927_s30 }
 0x19b   :  { %p934_p8 = por %p933_p7, %p932_p6 }
 0x19d   :  { %p935_p9 = pnand %p934_p8, %p928_p5 }
 0x1f8   :  { %v720_v63 = vpop.f32.mrf.mxu1 }
 0x1f9   :  { %v721_v0 = vadd.f32 %v720_v63, %v656_v61 }
 0x1fa   :  { %v722_v1 = vpop.f32.mrf.mxu1 }
 0x1fb   :  { %726 = vst.msk [vmem:[#allocation3] sm:$0x1] %vm659_vm2, %v721_v0 }
 0x1fc   :  { %v723_v2 = vpop.f32.mrf.mxu1 }
 0x1fd   :  { %938 = shalt.err (!%p935_p9)
}
 0x1fe   :  { %736 = dma.vmem_to_hbm [thread:$0]  %s734_s29, 16, %s1393_s13, [#allocation4]   ;;  %v724_v3 = vpop.f32.mrf.mxu1 }
 0x1ff   :  { %947 = dma.done.wait [#allocation4], 16  }
 0x200   :  { %948 = vsyncadd [#allocation4], 4294967280 }
 0x201   :  { %949 = dma.done.wait [#allocation6], 16  }
 0x202   :  { %950 = vsyncadd [#allocation6], 4294967280 }
 0x203   :  { %753 = vsyncpa [#allocation4], 1 }
 0x204   :  { %754 = vsyncpa [#allocation6], 1 }

</bundles_post_ra>
